<compile_context>
chip_gen: v7x
topology: tpu7x:2x2x1
jax: 0.10.0
libtpu: 0.0.40
codegen_flags: <defaults>
</compile_context>

<pallas_src>
import functools

import jax
import jax.numpy as jnp
from jax.experimental import pallas as pl
from jax.experimental.pallas import tpu as pltpu


# ----------------------------------------------------------------------------
# Pallas kernel: SSD multibox loss hot path (one batch entry per grid step)
# ----------------------------------------------------------------------------
def _multibox_loss_kernel(loc_p_ref, loc_t_ref, conf_ref, conf_t_ref, out_ref,
                          *, negpos_ratio, num_priors):
    C = conf_ref.shape[1]
    S = conf_ref.shape[2]
    L = conf_ref.shape[3]

    conf = conf_ref[...][0]          # [C, S, L] f32
    tgt = conf_t_ref[...][0, 0]      # [S, L]   i32 (-1 marks padded priors)
    valid = tgt >= 0                 # [S, L]
    pos = tgt > 0                    # [S, L]
    posf = pos.astype(jnp.float32)

    # ---- localization loss: smooth-L1 summed over positive priors ----------
    d = loc_p_ref[...][0] - loc_t_ref[...][0]                 # [4, S, L]
    ad = jnp.abs(d)
    sl1 = jnp.where(ad < 1.0, 0.5 * d * d, ad - 0.5)
    loss_l = jnp.sum(sl1 * posf[None, :, :])

    # ---- per-prior CE term: lse(conf) - conf[tgt] ---------------------------
    # Class axis is the short leading axis -> cheap sublane-style reductions
    # while all 128 lanes stay busy with distinct priors.
    row_max = jnp.max(conf, axis=0)                           # [S, L]
    lse = jnp.log(jnp.sum(jnp.exp(conf - row_max[None]), axis=0)) + row_max
    cls = jax.lax.broadcasted_iota(jnp.int32, (C, S, L), 0)
    onehot = (cls == tgt[None]).astype(jnp.float32)           # [C, S, L]
    gathered = jnp.sum(conf * onehot, axis=0)                 # [S, L]
    lc_all = lse - gathered                                   # [S, L], >= 0

    # ---- hard negative mining: top num_neg confidence losses among negatives
    num_pos = jnp.sum(posf)
    num_neg = jnp.minimum(jnp.float32(negpos_ratio) * num_pos,
                          jnp.float32(num_priors - 1))
    # Candidates = valid, non-positive priors. Sentinel -1 keeps positives and
    # padding out of the counts (all bisection thresholds are > 0).
    lc_m = jnp.where(valid & jnp.logical_not(pos), lc_all, jnp.float32(-1.0))
    hi0 = jnp.max(lc_m) + jnp.float32(1.0)

    def bisect(_, carry):
        lo, hi = carry
        mid = 0.5 * (lo + hi)
        cnt = jnp.sum((lc_m >= mid).astype(jnp.float32))
        take = cnt >= num_neg
        return jnp.where(take, mid, lo), jnp.where(take, hi, mid)

    lo, _ = jax.lax.fori_loop(0, 40, bisect,
                              (jnp.zeros((), jnp.float32), hi0))
    # Ties exactly at the converged threshold follow the same "arbitrary"
    # tie-break behaviour as torch.sort (which is not stable either).
    neg = lc_m >= lo                                          # [S, L]

    # ---- confidence loss summed over selected (pos | neg) priors -----------
    sel = posf + neg.astype(jnp.float32)      # disjoint masks
    loss_c = jnp.sum(lc_all * sel)

    # Pack the three per-image partials into lanes 0..2 of a lane-dense block.
    lane = jax.lax.broadcasted_iota(jnp.int32, (1, 1, L), 2)
    out_ref[...] = (jnp.where(lane == 0, loss_l, 0.0)
                    + jnp.where(lane == 1, loss_c, 0.0)
                    + jnp.where(lane == 2, num_pos, 0.0)).astype(jnp.float32)


def multibox_loss_pallas(loc_data, conf_data, loc_t, conf_t, negpos_ratio=3):
    """loc_data [B,P,4], conf_data [B,P,C], loc_t [B,P,4], conf_t [B,P] int."""
    B, P, C = conf_data.shape
    L = 128
    S = -(-P // L)
    P_pad = S * L
    pad = P_pad - P

    def prep(x, fill):
        # [B, P, K] -> [B, K, S, L]  (priors on the lane axis, padded to 128)
        x = jnp.transpose(x, (0, 2, 1))
        if pad:
            x = jnp.pad(x, ((0, 0), (0, 0), (0, pad)), constant_values=fill)
        return x.reshape(B, x.shape[1], S, L)

    loc_p4 = prep(loc_data.astype(jnp.float32), 0.0)
    loc_t4 = prep(loc_t.astype(jnp.float32), 0.0)
    conf4 = prep(conf_data.astype(jnp.float32), 0.0)
    tgt4 = prep(conf_t.astype(jnp.int32)[:, :, None], -1)

    kernel = functools.partial(_multibox_loss_kernel,
                               negpos_ratio=float(negpos_ratio),
                               num_priors=P)
    out = pl.pallas_call(
        kernel,
        out_shape=jax.ShapeDtypeStruct((B, 1, L), jnp.float32),
        grid_spec=pltpu.PrefetchScalarGridSpec(
            num_scalar_prefetch=0,
            grid=(B,),
            in_specs=[
                pl.BlockSpec((1, 4, S, L), lambda b: (b, 0, 0, 0)),
                pl.BlockSpec((1, 4, S, L), lambda b: (b, 0, 0, 0)),
                pl.BlockSpec((1, C, S, L), lambda b: (b, 0, 0, 0)),
                pl.BlockSpec((1, 1, S, L), lambda b: (b, 0, 0, 0)),
            ],
            out_specs=pl.BlockSpec((1, 1, L), lambda b: (b, 0, 0)),
        ),
        compiler_params=pltpu.CompilerParams(
            dimension_semantics=("parallel",)),
    )(loc_p4, loc_t4, conf4, tgt4)

    loss_l = jnp.sum(out[:, 0, 0])
    loss_c = jnp.sum(out[:, 0, 1])
    n = jnp.sum(out[:, 0, 2])
    # NOTE: like the PyTorch reference, N == 0 (no positive priors) gives NaN.
    return loss_l / n, loss_c / n


# ----------------------------------------------------------------------------
# Plain-JAX glue: prior/GT matching + encoding (target preparation)
# ----------------------------------------------------------------------------
def _point_form(priors):
    return jnp.concatenate([priors[:, :2] - priors[:, 2:] / 2,
                            priors[:, :2] + priors[:, 2:] / 2], axis=1)


def _match_single(threshold, truths, priors, variances, labels):
    """truths [O,4] point-form, labels [O] int, priors [P,4] center-size."""
    priors_pt = _point_form(priors)
    max_xy = jnp.minimum(truths[:, None, 2:], priors_pt[None, :, 2:])
    min_xy = jnp.maximum(truths[:, None, :2], priors_pt[None, :, :2])
    inter_wh = jnp.clip(max_xy - min_xy, 0.0, None)
    inter = inter_wh[..., 0] * inter_wh[..., 1]                       # [O,P]
    area_a = ((truths[:, 2] - truths[:, 0]) *
              (truths[:, 3] - truths[:, 1]))[:, None]
    area_b = ((priors_pt[:, 2] - priors_pt[:, 0]) *
              (priors_pt[:, 3] - priors_pt[:, 1]))[None, :]
    overlaps = inter / (area_a + area_b - inter)                      # [O,P]

    best_prior_idx = jnp.argmax(overlaps, axis=1)                     # [O]
    best_truth_overlap = jnp.max(overlaps, axis=0)                    # [P]
    best_truth_idx = jnp.argmax(overlaps, axis=0)                     # [P]
    best_truth_overlap = best_truth_overlap.at[best_prior_idx].set(2.0)
    best_truth_idx = best_truth_idx.at[best_prior_idx].set(
        jnp.arange(truths.shape[0]))

    matches = truths[best_truth_idx]                                  # [P,4]
    conf = labels[best_truth_idx] + 1                                 # [P]
    conf = jnp.where(best_truth_overlap < threshold, 0, conf)

    g_cxcy = (matches[:, :2] + matches[:, 2:]) / 2 - priors[:, :2]
    g_cxcy = g_cxcy / (variances[0] * priors[:, 2:])
    g_wh = (matches[:, 2:] - matches[:, :2]) / priors[:, 2:]
    # Like the reference, degenerate matched boxes (g_wh <= 0) would give
    # NaN/-inf here; callers are expected to supply valid boxes.
    g_wh = jnp.log(g_wh) / variances[1]
    loc = jnp.concatenate([g_cxcy, g_wh], axis=1)                     # [P,4]
    return loc, conf.astype(jnp.int32)


class MultiBoxLoss:
    """JAX/Pallas port of SSD MultiBoxLoss forward."""

    def __init__(self, num_classes, size, overlap_thresh, prior_for_matching,
                 bkg_label, neg_mining, neg_pos, neg_overlap, encode_target,
                 use_gpu=True):
        self.num_classes = num_classes
        self.threshold = overlap_thresh
        self.negpos_ratio = neg_pos
        self.variance = [0.1, 0.2]  # cfg['variance'] for both '300' and '512'

    def forward(self, predictions, target_boxes, target_labels):
        loc_data, conf_data, priors = predictions
        num = loc_data.shape[0]
        priors = priors[:loc_data.shape[1], :]

        loc_t_list, conf_t_list = [], []
        for idx in range(num):
            loc, conf = _match_single(self.threshold, target_boxes[idx],
                                      priors, self.variance,
                                      target_labels[idx])
            loc_t_list.append(loc)
            conf_t_list.append(conf)
        loc_t = jnp.stack(loc_t_list, axis=0)
        conf_t = jnp.stack(conf_t_list, axis=0)

        return multibox_loss_pallas(loc_data, conf_data, loc_t, conf_t,
                                    negpos_ratio=self.negpos_ratio)


# ----------------------------------------------------------------------------
if __name__ == "__main__":
    B, P, C, num_obj = 2, 128, 8, 3

    key = jax.random.PRNGKey(0)
    k1, k2, k3, k4, k5, k6, k7 = jax.random.split(key, 7)

    loc_data = 0.1 * jax.random.normal(k1, (B, P, 4), dtype=jnp.float32)
    conf_data = jax.random.normal(k2, (B, P, C), dtype=jnp.float32)

    # priors in center-size form (cx, cy, w, h), all positive
    centers = jax.random.uniform(k3, (P, 2), minval=0.2, maxval=0.8)
    wh = jax.random.uniform(k4, (P, 2), minval=0.1, maxval=0.3)
    priors = jnp.concatenate([centers, wh], axis=1).astype(jnp.float32)

    # ground truth boxes in point form with positive extents, labels in [0, C-2]
    tl = jax.random.uniform(k5, (B, num_obj, 2), minval=0.05, maxval=0.5)
    sz = jax.random.uniform(k6, (B, num_obj, 2), minval=0.2, maxval=0.45)
    gt_boxes = jnp.concatenate([tl, tl + sz], axis=2).astype(jnp.float32)
    gt_labels = jax.random.randint(k7, (B, num_obj), 0, C - 1)

    criterion = MultiBoxLoss(num_classes=C, size=300, overlap_thresh=0.5,
                             prior_for_matching=True, bkg_label=0,
                             neg_mining=True, neg_pos=3, neg_overlap=0.5,
                             encode_target=False)

    loss_l, loss_c = criterion.forward((loc_data, conf_data, priors),
                                       gt_boxes, gt_labels)
    loss_l = jax.block_until_ready(loss_l)
    loss_c = jax.block_until_ready(loss_c)

    assert jnp.isfinite(loss_l) and jnp.isfinite(loss_c)
    print("KERNEL_OK")
</pallas_src>

<mosaic_0001>
module attributes {stable_mosaic.version = 11 : i64} {
  func.func @_multibox_loss_kernel(%arg0: i32, %arg1: memref<1x4x1x128xf32, #tpu.memory_space<vmem>>, %arg2: memref<1x4x1x128xf32, #tpu.memory_space<vmem>>, %arg3: memref<1x8x1x128xf32, #tpu.memory_space<vmem>>, %arg4: memref<1x1x1x128xi32, #tpu.memory_space<vmem>>, %arg5: memref<1x1x128xf32, #tpu.memory_space<vmem>>) attributes {dimension_semantics = [#tpu.dimension_semantics<parallel>], iteration_bounds = array<i64: 2>, scalar_prefetch = 0 : i64, scratch_operands = 0 : i64, tpu.core_type = #tpu.core_type<tc>, window_params = [{transform_indices = @transform_0, window_bounds = array<i64: 1, 4, 1, 128>}, {transform_indices = @transform_1, window_bounds = array<i64: 1, 4, 1, 128>}, {transform_indices = @transform_2, window_bounds = array<i64: 1, 8, 1, 128>}, {transform_indices = @transform_3, window_bounds = array<i64: 1, 1, 1, 128>}, {transform_indices = @transform_4, window_bounds = array<i64: 1, 1, 128>}]} {
    %c0 = arith.constant 0 : index
    %c0_0 = arith.constant 0 : index
    %c0_1 = arith.constant 0 : index
    %c0_2 = arith.constant 0 : index
    %0 = vector.load %arg3[%c0, %c0_0, %c0_1, %c0_2] : memref<1x8x1x128xf32, #tpu.memory_space<vmem>>, vector<1x8x1x128xf32>
    %1 = vector.shape_cast %0 : vector<1x8x1x128xf32> to vector<8x1x128xf32>
    %c0_3 = arith.constant 0 : index
    %c0_4 = arith.constant 0 : index
    %c0_5 = arith.constant 0 : index
    %c0_6 = arith.constant 0 : index
    %2 = vector.load %arg4[%c0_3, %c0_4, %c0_5, %c0_6] : memref<1x1x1x128xi32, #tpu.memory_space<vmem>>, vector<1x1x1x128xi32>
    %3 = vector.shape_cast %2 : vector<1x1x1x128xi32> to vector<1x128xi32>
    %c0_i32 = arith.constant 0 : i32
    %4 = vector.broadcast %c0_i32 : i32 to vector<1x128xi32>
    %5 = arith.cmpi sge, %3, %4 : vector<1x128xi32>
    %c0_i32_7 = arith.constant 0 : i32
    %6 = vector.broadcast %c0_i32_7 : i32 to vector<1x128xi32>
    %7 = arith.cmpi sgt, %3, %6 : vector<1x128xi32>
    %8 = arith.extui %7 : vector<1x128xi1> to vector<1x128xi32>
    %9 = arith.sitofp %8 : vector<1x128xi32> to vector<1x128xf32>
    %c0_8 = arith.constant 0 : index
    %c0_9 = arith.constant 0 : index
    %c0_10 = arith.constant 0 : index
    %c0_11 = arith.constant 0 : index
    %10 = vector.load %arg1[%c0_8, %c0_9, %c0_10, %c0_11] : memref<1x4x1x128xf32, #tpu.memory_space<vmem>>, vector<1x4x1x128xf32>
    %11 = vector.shape_cast %10 : vector<1x4x1x128xf32> to vector<4x1x128xf32>
    %c0_12 = arith.constant 0 : index
    %c0_13 = arith.constant 0 : index
    %c0_14 = arith.constant 0 : index
    %c0_15 = arith.constant 0 : index
    %12 = vector.load %arg2[%c0_12, %c0_13, %c0_14, %c0_15] : memref<1x4x1x128xf32, #tpu.memory_space<vmem>>, vector<1x4x1x128xf32>
    %13 = vector.shape_cast %12 : vector<1x4x1x128xf32> to vector<4x1x128xf32>
    %14 = arith.subf %11, %13 : vector<4x1x128xf32>
    %15 = math.absf %14 : vector<4x1x128xf32>
    %cst = arith.constant 1.000000e+00 : f32
    %16 = vector.broadcast %cst : f32 to vector<4x1x128xf32>
    %17 = arith.cmpf olt, %15, %16 : vector<4x1x128xf32>
    %cst_16 = arith.constant 5.000000e-01 : f32
    %18 = vector.broadcast %cst_16 : f32 to vector<4x1x128xf32>
    %19 = arith.mulf %18, %14 : vector<4x1x128xf32>
    %20 = arith.mulf %19, %14 : vector<4x1x128xf32>
    %cst_17 = arith.constant 5.000000e-01 : f32
    %21 = vector.broadcast %cst_17 : f32 to vector<4x1x128xf32>
    %22 = arith.subf %15, %21 : vector<4x1x128xf32>
    %23 = arith.select %17, %20, %22 : vector<4x1x128xi1>, vector<4x1x128xf32>
    %24 = vector.shape_cast %9 : vector<1x128xf32> to vector<1x1x128xf32>
    %25 = vector.broadcast %24 : vector<1x1x128xf32> to vector<4x1x128xf32>
    %26 = arith.mulf %23, %25 : vector<4x1x128xf32>
    %27 = vector.shape_cast %26 : vector<4x1x128xf32> to vector<1x4x1x128xf32>
    %cst_18 = arith.constant dense<0.000000e+00> : vector<1xf32>
    %28 = vector.multi_reduction <add>, %27, %cst_18 [1, 2, 3] : vector<1x4x1x128xf32> to vector<1xf32>
    %29 = vector.shape_cast %28 : vector<1xf32> to vector<1x1x1x1xf32>
    %30 = vector.extract %29[0, 0, 0, 0] : f32 from vector<1x1x1x1xf32>
    %cst_19 = arith.constant dense<0xFF800000> : vector<1x128xf32>
    %31 = vector.multi_reduction <maximumf>, %1, %cst_19 [0] : vector<8x1x128xf32> to vector<1x128xf32>
    %32 = vector.shape_cast %31 : vector<1x128xf32> to vector<1x1x128xf32>
    %33 = vector.broadcast %32 : vector<1x1x128xf32> to vector<8x1x128xf32>
    %34 = arith.subf %1, %33 : vector<8x1x128xf32>
    %35 = math.exp %34 : vector<8x1x128xf32>
    %cst_20 = arith.constant dense<0.000000e+00> : vector<1x128xf32>
    %36 = vector.multi_reduction <add>, %35, %cst_20 [0] : vector<8x1x128xf32> to vector<1x128xf32>
    %37 = math.log %36 : vector<1x128xf32>
    %38 = arith.addf %37, %31 : vector<1x128xf32>
    %39 = tpu.iota {dimensions = array<i32: 0>} : vector<8x1x128xi32>
    %40 = vector.shape_cast %3 : vector<1x128xi32> to vector<1x1x128xi32>
    %41 = vector.broadcast %40 : vector<1x1x128xi32> to vector<8x1x128xi32>
    %42 = arith.cmpi eq, %39, %41 : vector<8x1x128xi32>
    %43 = arith.extui %42 : vector<8x1x128xi1> to vector<8x1x128xi32>
    %44 = arith.sitofp %43 : vector<8x1x128xi32> to vector<8x1x128xf32>
    %45 = arith.mulf %1, %44 : vector<8x1x128xf32>
    %cst_21 = arith.constant dense<0.000000e+00> : vector<1x128xf32>
    %46 = vector.multi_reduction <add>, %45, %cst_21 [0] : vector<8x1x128xf32> to vector<1x128xf32>
    %47 = arith.subf %38, %46 : vector<1x128xf32>
    %48 = vector.shape_cast %9 : vector<1x128xf32> to vector<1x1x128xf32>
    %cst_22 = arith.constant dense<0.000000e+00> : vector<1xf32>
    %49 = vector.multi_reduction <add>, %48, %cst_22 [1, 2] : vector<1x1x128xf32> to vector<1xf32>
    %50 = vector.shape_cast %49 : vector<1xf32> to vector<1x1x1xf32>
    %51 = vector.extract %50[0, 0, 0] : f32 from vector<1x1x1xf32>
    %cst_23 = arith.constant 3.000000e+00 : f32
    %52 = arith.mulf %cst_23, %51 : f32
    %cst_24 = arith.constant 1.270000e+02 : f32
    %53 = arith.minimumf %52, %cst_24 : f32
    %cst_25 = arith.constant dense<true> : vector<1x128xi1>
    %54 = arith.xori %7, %cst_25 : vector<1x128xi1>
    %55 = arith.andi %5, %54 : vector<1x128xi1>
    %cst_26 = arith.constant -1.000000e+00 : f32
    %56 = vector.broadcast %cst_26 : f32 to vector<1x128xf32>
    %57 = arith.select %55, %47, %56 : vector<1x128xi1>, vector<1x128xf32>
    %58 = vector.shape_cast %57 : vector<1x128xf32> to vector<1x1x128xf32>
    %cst_27 = arith.constant dense<0xFF800000> : vector<1xf32>
    %59 = vector.multi_reduction <maximumf>, %58, %cst_27 [1, 2] : vector<1x1x128xf32> to vector<1xf32>
    %60 = vector.shape_cast %59 : vector<1xf32> to vector<1x1x1xf32>
    %61 = vector.extract %60[0, 0, 0] : f32 from vector<1x1x1xf32>
    %cst_28 = arith.constant 1.000000e+00 : f32
    %62 = arith.addf %61, %cst_28 : f32
    %cst_29 = arith.constant 0.000000e+00 : f32
    %c0_i32_30 = arith.constant 0 : i32
    %c40_i32 = arith.constant 40 : i32
    %63 = arith.addi %c0_i32_30, %c40_i32 : i32
    %c1_i32 = arith.constant 1 : i32
    %64:2 = scf.for %arg6 = %c0_i32_30 to %63 step %c1_i32 iter_args(%arg7 = %cst_29, %arg8 = %62) -> (f32, f32)  : i32 {
      %94 = arith.addf %arg7, %arg8 : f32
      %cst_40 = arith.constant 5.000000e-01 : f32
      %95 = arith.mulf %cst_40, %94 : f32
      %96 = vector.broadcast %95 : f32 to vector<1x128xf32>
      %97 = arith.cmpf oge, %57, %96 : vector<1x128xf32>
      %98 = arith.extui %97 : vector<1x128xi1> to vector<1x128xi32>
      %99 = arith.sitofp %98 : vector<1x128xi32> to vector<1x128xf32>
      %100 = vector.shape_cast %99 : vector<1x128xf32> to vector<1x1x128xf32>
      %cst_41 = arith.constant dense<0.000000e+00> : vector<1xf32>
      %101 = vector.multi_reduction <add>, %100, %cst_41 [1, 2] : vector<1x1x128xf32> to vector<1xf32>
      %102 = vector.shape_cast %101 : vector<1xf32> to vector<1x1x1xf32>
      %103 = vector.extract %102[0, 0, 0] : f32 from vector<1x1x1xf32>
      %104 = arith.cmpf oge, %103, %53 : f32
      %105 = arith.select %104, %95, %arg7 : f32
      %106 = arith.select %104, %arg8, %95 : f32
      scf.yield %105, %106 : f32, f32
    }
    %65 = vector.broadcast %64#0 : f32 to vector<1x128xf32>
    %66 = arith.cmpf oge, %57, %65 : vector<1x128xf32>
    %67 = arith.extui %66 : vector<1x128xi1> to vector<1x128xi32>
    %68 = arith.sitofp %67 : vector<1x128xi32> to vector<1x128xf32>
    %69 = arith.addf %9, %68 : vector<1x128xf32>
    %70 = arith.mulf %47, %69 : vector<1x128xf32>
    %71 = vector.shape_cast %70 : vector<1x128xf32> to vector<1x1x128xf32>
    %cst_31 = arith.constant dense<0.000000e+00> : vector<1xf32>
    %72 = vector.multi_reduction <add>, %71, %cst_31 [1, 2] : vector<1x1x128xf32> to vector<1xf32>
    %73 = vector.shape_cast %72 : vector<1xf32> to vector<1x1x1xf32>
    %74 = vector.extract %73[0, 0, 0] : f32 from vector<1x1x1xf32>
    %75 = tpu.iota {dimensions = array<i32: 2>} : vector<1x1x128xi32>
    %c0_i32_32 = arith.constant 0 : i32
    %76 = vector.broadcast %c0_i32_32 : i32 to vector<1x1x128xi32>
    %77 = arith.cmpi eq, %75, %76 : vector<1x1x128xi32>
    %cst_33 = arith.constant 0.000000e+00 : f32
    %78 = vector.broadcast %30 : f32 to vector<1x1x128xf32>
    %79 = vector.broadcast %cst_33 : f32 to vector<1x1x128xf32>
    %80 = arith.select %77, %78, %79 : vector<1x1x128xi1>, vector<1x1x128xf32>
    %c1_i32_34 = arith.constant 1 : i32
    %81 = vector.broadcast %c1_i32_34 : i32 to vector<1x1x128xi32>
    %82 = arith.cmpi eq, %75, %81 : vector<1x1x128xi32>
    %cst_35 = arith.constant 0.000000e+00 : f32
    %83 = vector.broadcast %74 : f32 to vector<1x1x128xf32>
    %84 = vector.broadcast %cst_35 : f32 to vector<1x1x128xf32>
    %85 = arith.select %82, %83, %84 : vector<1x1x128xi1>, vector<1x1x128xf32>
    %86 = arith.addf %80, %85 : vector<1x1x128xf32>
    %c2_i32 = arith.constant 2 : i32
    %87 = vector.broadcast %c2_i32 : i32 to vector<1x1x128xi32>
    %88 = arith.cmpi eq, %75, %87 : vector<1x1x128xi32>
    %cst_36 = arith.constant 0.000000e+00 : f32
    %89 = vector.broadcast %51 : f32 to vector<1x1x128xf32>
    %90 = vector.broadcast %cst_36 : f32 to vector<1x1x128xf32>
    %91 = arith.select %88, %89, %90 : vector<1x1x128xi1>, vector<1x1x128xf32>
    %92 = arith.addf %86, %91 : vector<1x1x128xf32>
    %c0_37 = arith.constant 0 : index
    %c0_38 = arith.constant 0 : index
    %c0_39 = arith.constant 0 : index
    %93 = vector.load %arg5[%c0_37, %c0_38, %c0_39] : memref<1x1x128xf32, #tpu.memory_space<vmem>>, vector<1x1x128xf32>
    tpu.vector_store %arg5[%c0_37, %c0_38, %c0_39], %92 {strides = array<i32>} : memref<1x1x128xf32, #tpu.memory_space<vmem>>, vector<1x1x128xf32>,
    return
  }
  func.func @transform_0(%arg0: i32) -> (i32, i32, i32, i32) {
    %c0_i32 = arith.constant 0 : i32
    %c0_i32_0 = arith.constant 0 : i32
    %c0_i32_1 = arith.constant 0 : i32
    %c0_i32_2 = arith.constant 0 : i32
    return %arg0, %c0_i32, %c0_i32_0, %c0_i32_1 : i32, i32, i32, i32
  }
  func.func @transform_1(%arg0: i32) -> (i32, i32, i32, i32) {
    %c0_i32 = arith.constant 0 : i32
    %c0_i32_0 = arith.constant 0 : i32
    %c0_i32_1 = arith.constant 0 : i32
    %c0_i32_2 = arith.constant 0 : i32
    return %arg0, %c0_i32, %c0_i32_0, %c0_i32_1 : i32, i32, i32, i32
  }
  func.func @transform_2(%arg0: i32) -> (i32, i32, i32, i32) {
    %c0_i32 = arith.constant 0 : i32
    %c0_i32_0 = arith.constant 0 : i32
    %c0_i32_1 = arith.constant 0 : i32
    %c0_i32_2 = arith.constant 0 : i32
    return %arg0, %c0_i32, %c0_i32_0, %c0_i32_1 : i32, i32, i32, i32
  }
  func.func @transform_3(%arg0: i32) -> (i32, i32, i32, i32) {
    %c0_i32 = arith.constant 0 : i32
    %c0_i32_0 = arith.constant 0 : i32
    %c0_i32_1 = arith.constant 0 : i32
    %c0_i32_2 = arith.constant 0 : i32
    return %arg0, %c0_i32, %c0_i32_0, %c0_i32_1 : i32, i32, i32, i32
  }
  func.func @transform_4(%arg0: i32) -> (i32, i32, i32) {
    %c0_i32 = arith.constant 0 : i32
    %c0_i32_0 = arith.constant 0 : i32
    %c0_i32_1 = arith.constant 0 : i32
    return %arg0, %c0_i32, %c0_i32_0 : i32, i32, i32
  }
}

</mosaic_0001>

<bundles_post_ra>
// kernel: tpu_custom_call.1
= control target key start
LH: loop header
LB: loop body
LE: loop exit
PB: predicated region body
PF: predicated region fallthrough
CT: control target
= control target key end

     0   :  { %s1536_s0 = inlined_call_operand.hbm [shape: f32[2,4,1,128], index: 0, kind: input, shape index: {}]   ;;  %s1537_s1 = inlined_call_operand.hbm [shape: f32[2,4,1,128], index: 1, kind: input, shape index: {}]   ;;  %s1538_s2 = inlined_call_operand.hbm [shape: f32[2,8,1,128], index: 2, kind: input, shape index: {}]   ;;  %s1539_s3 = inlined_call_operand.vmem [shape: s32[2,1,1,128], index: 3, kind: input, shape index: {}]   ;;  %s1540_s4 = inlined_call_operand.hbm [shape: f32[2,1,128], index: 4, kind: output, shape index: {}]  }
   0x1   :  { %1547 = sst [smem:[#allocation12_spill]] %s1536_s0 }
   0x2   :  { %1548 = sst [smem:[#allocation13_spill]] %s1537_s1 }
   0x3   :  { %9 = vsyncpa [#allocation3], 0 }
   0x4   :  { %11 = vsyncpa [#allocation3 + $0x1], 0 }
   0x5   :  { %12 = vsyncpa [#allocation6], 0 }
   0x6   :  { %14 = vsyncpa [#allocation6 + $0x1], 0 }
   0x7   :  { %15 = vsyncpa [#allocation4], 0 }
   0x8   :  { %17 = vsyncpa [#allocation4 + $0x1], 0  ;;  %s1082_s15 = smov 0   ;;  %s1084_s16 = smov 0  }
   0x9   :  { %s1086_s17 = smov 0   ;;  %s1088_s18 = smov 0  }
   0xa LB: > { %s1103_s19 = sadd.s32 4294967295, %s1033_s18   ;;  %s710_s20 = sadd.s32 4294967294, %s1033_s18   ;;  %s1033_s18 = sphi %s1088_s18, %s1579_s18   ;;  %s1029_s17 = sphi %s1086_s17, %s1578_s17   ;;  %s1025_s16 = sphi %s1084_s16, %s1577_s16   ;;  %s1021_s15 = sphi %s1082_s15, %s1576_s15  }
   0xb   : > { %s1107_s21 = sadd.s32 1, %s1033_s18   ;;  %s30_s22 = sadd.s32 1, %s1029_s17 }
   0xc   : > { %s27_s23 = ssub.s32 %s1033_s18, %s1107_s21  ;;  %p37_p0 = scmp.ne.s32.totalorder %s1029_s17, %s1025_s16 }
   0xd   : > { %p28_p1 = scmp.eq.s32.totalorder %s27_s23, 0  ;;  %p38_p2 = scmp.eq.s32.totalorder %s1033_s18, 0 }
   0xe   : > { %p43_p3 = scmp.ne.s32.totalorder %s1025_s16, %s1021_s15  ;;  %p44_p4 = scmp.eq.s32.totalorder %s1103_s19, 0 }
   0xf   : > { %s1119_s24 = scalar_select %p28_p1, %s1029_s17, %s30_s22  }
  0x10   : > { %p39_p5 = por %p38_p2, %p37_p0  ;;  %p1121_p6 = por %p44_p4, %p43_p3 }
  0x11   : > { %p145_p7 = scmp.eq.s32.totalorder %s1103_s19, 1  ;;  %p151_p8 = scmp.eq.s32.totalorder %s710_s20, 1 }
  0x12   : > { %s1549_s25 = scalar_select %p1121_p6, 1, 0 }
  0x13   : > { %p779_p10 = scmp.lt.s32.totalorder %s1033_s18, 2  ;;  %p1128_p11 = por %p145_p7, %p37_p0 }
  0x14   : > { %p1132_p12 = por %p151_p8, %p43_p3  ;;  %s1137_s28 = sand.u32 1, %s1029_s17  }
  0x15   : > { %s1550_s26 = scalar_select %p1128_p11, 1, 0 }
  0x16   : > { %s1551_s27 = scalar_select %p1132_p12, 1, 0 }
  0x17   : > { %s744_s29 = sshll.u32 %s1033_s18, 6  ;;  %s713_s30 = sshll.u32 %s1137_s28, 2 }
  0x18   : > { %p1141_p13 = pnand %p779_p10, %p39_p5  ;;  %s192_s6 = sand.u32 1, %s1033_s18  }
  0x19   : > { %s1553_s1 = sld [smem:[#allocation13_spill]]  ;;  %s196_s10 = scalar_lea.vmem [#allocation5], %s713_s30 }
  0x1a   : > { %s203_s11 = sshll.u32 %s196_s10, 4  ;;  %s1158_s12 = scalar_lea.sflag [#allocation6], %s192_s6  ;;  %s1155_s11 = int_to_ptr.vmem [resolvable:$true] %s203_s11 }
  0x1b   : > { %p1164_p2 = pneg %p1141_p13 }
  0x1f   : > { %s1151_s9 = scalar_lea.hbm %s1553_s1, %s744_s29  ;;  %s866_s23 = scalar_lea.hbm %s1553_s1, 128 }
  0x20   : > { %s861_s13 = scalar_lea.hbm %s1151_s9, 64  ;;  %p867_p5 = scmp.lt.u32.totalorder %s1151_s9, %s1553_s1 }
  0x21   : > { %p862_p1 = scmp.ne.s32.totalorder %s1151_s9, %s861_s13  ;;  %p868_p7 = scmp.lt.u32.totalorder %s866_s23, %s861_s13 }
  0x22   : > { %p870_p10 = scmp.lt.u32.totalorder %s861_s13, %s1151_s9 }
  0x23   : > { %p864_p3 = pnand %p1164_p2, %p862_p1  ;;  %p869_p8 = por %p868_p7, %p867_p5 }
  0x25   : > { %p865_p4 = pneg %p864_p3  ;;  %p871_p9 = por %p870_p10, %p869_p8 }
  0x27   : > { %p872_p0 = pnand %p871_p9, %p865_p4 }
  0x29   : > { %875 = shalt.err (!%p872_p0)
}
  0x2a   : > { %s876_s6 = scalar_lea.vmem %s1155_s11, 64  ;;  %s1047_s10 = smov [#allocation5]  }
  0x2b   : > { %p877_p1 = scmp.ne.s32.totalorder %s1155_s11, %s876_s6  ;;  %s881_s20 = sshll.u32 %s1047_s10, 4  ;;  %s882_s20 = int_to_ptr.vmem [resolvable:$false] %s881_s20 }
  0x2c   : > { %s883_s22 = scalar_lea.vmem %s882_s20, 128  ;;  %p884_p11 = scmp.lt.s32.totalorder %s1155_s11, %s882_s20 }
  0x2d   : > { %p879_p3 = pnand %p877_p1, %p1164_p2  ;;  %p885_p6 = scmp.lt.s32.totalorder %s883_s22, %s876_s6 }
  0x2f   : > { %p880_p12 = pneg %p879_p3  ;;  %p886_p5 = por %p885_p6, %p884_p11 }
  0x31   : > { %p887_p7 = pnand %p886_p5, %p880_p12 }
  0x33   : > { %890 = shalt.err (!%p887_p7)
}
  0x34   : > { %s1543_s13 = smov 16   ;;  %s1545_s23 = smov 1  }
  0x35   : > { %771 = dma.hbm_to_vmem [thread:$0]  (!%p1141_p13), %s1151_s9, 64, %s1155_s11, %s1158_s12, %s1543_s13, %s1543_s13, %s1545_s23  }
  0x36   : > { %p238_p6 = scmp.lt.s32.totalorder %s1033_s18, 3  ;;  %s1555_s0 = sld [smem:[#allocation12_spill]] }
  0x37   : > { %p1556_p9 = scmp.ge.s32.totalorder %s1033_s18, 1  ;;  %s175_s20 = scalar_lea.vmem [#allocation2], %s713_s30 }
  0x38   : > { %s182_s22 = sshll.u32 %s175_s20, 4  ;;  %s719_s9 = sshll.u32 %s1137_s28, 3  ;;  %s1207_s22 = int_to_ptr.vmem [resolvable:$true] %s182_s22 }
  0x39   : > { %p1201_p11 = pnand %p1556_p9, %p238_p6  ;;  %s172_s11 = scalar_lea.sflag [#allocation3], %s1137_s28 }
  0x3b   : > { %s1557_s10 = scalar_select %p1201_p11, 1, 0 }
  0x3c   : > { %s1197_s6 = scalar_lea.hbm %s1555_s0, %s744_s29  ;;  %s896_s8 = scalar_lea.hbm %s1555_s0, 128 }
  0x3d   : > { %s891_s13 = scalar_lea.hbm %s1197_s6, 64  ;;  %p897_p8 = scmp.lt.u32.totalorder %s1197_s6, %s1555_s0 }
  0x3e   : > { %p892_p12 = scmp.ne.s32.totalorder %s1197_s6, %s891_s13  ;;  %p898_p10 = scmp.lt.u32.totalorder %s896_s8, %s891_s13 }
  0x3f   : > { %p900_p3 = scmp.lt.u32.totalorder %s891_s13, %s1197_s6 }
  0x40   : > { %p894_p0 = pnand %p892_p12, %p1164_p2  ;;  %p899_p1 = por %p898_p10, %p897_p8 }
  0x42   : > { %p895_p4 = pneg %p894_p0  ;;  %p901_p5 = por %p900_p3, %p899_p1 }
  0x44   : > { %p902_p7 = pnand %p901_p5, %p895_p4 }
  0x46   : > { %905 = shalt.err (!%p902_p7)
}
  0x47   : > { %s906_s30 = scalar_lea.vmem %s1207_s22, 64  ;;  %s1050_s20 = smov [#allocation2]  }
  0x48   : > { %p907_p6 = scmp.ne.s32.totalorder %s1207_s22, %s906_s30  ;;  %s911_s29 = sshll.u32 %s1050_s20, 4  ;;  %s912_s29 = int_to_ptr.vmem [resolvable:$false] %s911_s29 }
  0x49   : > { %s913_s1 = scalar_lea.vmem %s912_s29, 128  ;;  %p914_p0 = scmp.lt.s32.totalorder %s1207_s22, %s912_s29 }
  0x4a   : > { %p909_p9 = pnand %p907_p6, %p1164_p2  ;;  %p915_p11 = scmp.lt.s32.totalorder %s913_s1, %s906_s30 }
  0x4c   : > { %p910_p12 = pneg %p909_p9  ;;  %p916_p8 = por %p915_p11, %p914_p0 }
  0x4e   : > { %p917_p10 = pnand %p916_p8, %p910_p12 }
  0x50   : > { %920 = shalt.err (!%p917_p10)
}
  0x51   : > { %s1558_s13 = smov 1   ;;  %s1559_s23 = smov 16  }
  0x52   : > { %768 = dma.hbm_to_vmem [thread:$0]  (!%p1141_p13), %s1197_s6, 64, %s1207_s22, %s172_s11, %s1559_s23, %s1559_s23, %s1558_s13  }
  0x53   : > { %s746_s7 = sshll.u32 %s1033_s18, 7  ;;  %s217_s29 = scalar_lea.vmem [#allocation7], %s719_s9 }
  0x54   : > { %s1241_s30 = scalar_lea.hbm %s1538_s2, %s746_s7  ;;  %s224_s1 = sshll.u32 %s217_s29, 4  ;;  %s1245_s1 = int_to_ptr.vmem [resolvable:$true] %s224_s1 }
  0x55   : > { %s921_s0 = scalar_lea.hbm %s1241_s30, 128  ;;  %s926_s11 = scalar_lea.hbm %s1538_s2, 256 }
  0x56   : > { %p922_p11 = scmp.ne.s32.totalorder %s1241_s30, %s921_s0  ;;  %p927_p3 = scmp.lt.u32.totalorder %s1241_s30, %s1538_s2 }
  0x57   : > { %p928_p5 = scmp.lt.u32.totalorder %s926_s11, %s921_s0  ;;  %p930_p6 = scmp.lt.u32.totalorder %s921_s0, %s1241_s30 }
  0x58   : > { %p924_p4 = pnand %p922_p11, %p1164_p2 }
  0x59   : > { %p929_p7 = por %p928_p5, %p927_p3 }
  0x5a   : > { %p925_p1 = pneg %p924_p4 }
  0x5b   : > { %p931_p9 = por %p930_p6, %p929_p7 }
  0x5d   : > { %p932_p12 = pnand %p931_p9, %p925_p1 }
  0x5f   : > { %935 = shalt.err (!%p932_p12)
}
  0x60   : > { %s936_s28 = scalar_lea.vmem %s1245_s1, 128  ;;  %s1051_s9 = smov [#allocation7]  }
  0x61   : > { %p937_p0 = scmp.ne.s32.totalorder %s1245_s1, %s936_s28  ;;  %s941_s20 = sshll.u32 %s1051_s9, 4  ;;  %s942_s20 = int_to_ptr.vmem [resolvable:$false] %s941_s20 }
  0x62   : > { %s943_s29 = scalar_lea.vmem %s942_s20, 256  ;;  %p944_p11 = scmp.lt.s32.totalorder %s1245_s1, %s942_s20 }
  0x63   : > { %p939_p8 = pnand %p937_p0, %p1164_p2  ;;  %p945_p4 = scmp.lt.s32.totalorder %s943_s29, %s936_s28 }
  0x65   : > { %p940_p10 = pneg %p939_p8  ;;  %p946_p3 = por %p945_p4, %p944_p11 }
  0x67   : > { %p947_p5 = pnand %p946_p3, %p940_p10 }
  0x69   : > { %950 = shalt.err (!%p947_p5)
}
  0x6a   : > { %774 = dma.hbm_to_vmem [thread:$0]  (!%p1141_p13), %s1241_s30, 128, %s1245_s1, %s1158_s12, %s1559_s23, %s1559_s23, %s1558_s13  }
  0x6b   : > { %p1560_p2 = scmp.ne.s32.totalorder %s1557_s10, 0 }
  0x6c   : > { %s1275_s0 = sand.u32 (!%p1560_p2), 1, %s1025_s16   ;;  %p1561_p1 = scmp.ne.s32.totalorder (!%p1560_p2), %s1549_s25, 0 }
  0x6d   : > { %242 = sbr.rel (%p1560_p2) target bundleno = 846 (0x34e), region = 36  ;;  %s723_s14 = sshll.u32 (!%p1560_p2), %s1275_s0, 2 }
  0x6e   : > { %s245_s6 = scalar_lea.sflag (!%p1560_p2), [#allocation3], %s1275_s0  ;;  %s248_s22 = scalar_lea.vmem (!%p1560_p2), [#allocation2], %s723_s14 }
  0x74   : > { %1008 = dma.done.wait (%p1561_p1), %s245_s6, 64  }
  0x75   : > { %1010 = vsyncadd (%p1561_p1), %s245_s6, 4294967232  ;;  %s253_s5 = sand.u32 1, %s1103_s19   ;;  %s257_s10 = scalar_lea.vmem [#allocation5], %s723_s14 }
  0x76   : > { %s254_s12 = scalar_lea.sflag [#allocation6], %s253_s5 }
  0x77   : > { %1012 = dma.done.wait (%p1561_p1), %s254_s12, 192  }
  0x78   : > { %1014 = vsyncadd (%p1561_p1), %s254_s12, 4294967104  ;;  %p303_p13 = scmp.lt.s32.totalorder %s1103_s19, 1  ;;  %s725_s11 = sshll.u32 %s1275_s0, 3  ;;  %v319_v1 = vld [vmem:[%s248_s22] sm:$0x1]  ;;  %v376_v3 = vlaneseq  ;;  %v1052_v12 = vmov 0.0  }
  0x79   : > { %v320_v2 = vld [vmem:[%s248_s22 + $0x1] sm:$0x1]  ;;  %v321_v4 = vld [vmem:[%s248_s22 + $0x2] sm:$0x1]  ;;  %v322_v5 = vld [vmem:[%s248_s22 + $0x3] sm:$0x1] }
  0x7a   : > { %s304_s13 = scalar_select %p303_p13, %s1103_s19, 1  ;;  %v323_v6 = vld [vmem:[%s257_s10] sm:$0x1]  ;;  %v324_v7 = vld [vmem:[%s257_s10 + $0x1] sm:$0x1]  ;;  %vm1303_vm1 = vcmp.lt.s32.totalorder %v376_v3, 128 }
  0x7b   : > { %v325_v8 = vld [vmem:[%s257_s10 + $0x2] sm:$0x1]  ;;  %v326_v9 = vld [vmem:[%s257_s10 + $0x3] sm:$0x1]  ;;  %v327_v10 = vsub.f32 %v319_v1, %v323_v6  ;;  %v328_v11 = vsub.f32 %v320_v2, %v324_v7  ;;  %vm359_vm2 = vcmask 1040384   ;;  %s266_s25 = scalar_lea.vmem [#allocation7], %s725_s11 }
  0x7c   : > { %s305_s1 = scalar_lea.vmem %s1539_s3, %s304_s13  ;;  %v329_v14 = vsub.f32 %v321_v4, %v325_v8  ;;  %v330_v15 = vsub.f32 %v322_v5, %v326_v9  ;;  %v1307_v21 = vld [vmem:[%s266_s25] sm:$0x1]  ;;  %v1309_v22 = vld [vmem:[%s266_s25 + $0x1] sm:$0x1]  ;;  %v1319_v31 = vld [vmem:[%s266_s25 + $0x2] sm:$0x1] }
  0x7d   : > { %v1294_v0 = vld [vmem:[%s305_s1] sm:$0x1]  ;;  %v331_v17 = vand.u32 2147483647, %v327_v10  ;;  %v332_v18 = vand.u32 2147483647, %v328_v11 }
  0x7e   : > { %vm316_vm0 = vcmp.gt.s32.totalorder %v1294_v0, 0  ;;  %v339_v19 = vmul.f32 0.5, %v327_v10  ;;  %v340_v20 = vmul.f32 0.5, %v328_v11  ;;  %v333_v23 = vand.u32 2147483647, %v329_v14  ;;  %s1054_s9 = smov 127.0  }
  0x7f   : > { %v1300_v13 = vsel %vm316_vm0, 1.0, %v1052_v12  ;;  %v334_v24 = vand.u32 2147483647, %v330_v15  ;;  %v341_v25 = vmul.f32 0.5, %v329_v14  ;;  %v342_v26 = vmul.f32 0.5, %v330_v15  ;;  %s302_s6 = scalar_lea.vmem [#allocation8], %s1275_s0 }
  0x80   : > { %vm1311_vm3 = vcmp.lt.f32.partialorder %v331_v17, 1.0  ;;  %vm1315_vm4 = vcmp.lt.f32.partialorder %v332_v18, 1.0  ;;  %v343_v29 = vmul.f32 %v339_v19, %v327_v10  ;;  %v344_v30 = vmul.f32 %v340_v20, %v328_v11  ;;  %v1321_v32 = vld [vmem:[%s266_s25 + $0x3] sm:$0x1]  ;;  %v1331_v37 = vld [vmem:[%s266_s25 + $0x4] sm:$0x1] }
  0x81   : > { %vm1323_vm5 = vcmp.lt.f32.partialorder %v333_v23, 1.0  ;;  %vm1327_vm6 = vcmp.lt.f32.partialorder %v334_v24, 1.0  ;;  %v345_v35 = vmul.f32 %v341_v25, %v329_v14  ;;  %v346_v36 = vmul.f32 %v342_v26, %v330_v15  ;;  %v1333_v38 = vld [vmem:[%s266_s25 + $0x5] sm:$0x1]  ;;  %v1335_v43 = vld [vmem:[%s266_s25 + $0x6] sm:$0x1] }
  0x82   : > { %v727_v39 = vadd.f32 -0.5, %v331_v17  ;;  %v728_v40 = vadd.f32 -0.5, %v332_v18  ;;  %v729_v41 = vadd.f32 -0.5, %v333_v23  ;;  %v730_v42 = vadd.f32 -0.5, %v334_v24  ;;  %v1337_v44 = vld [vmem:[%s266_s25 + $0x7] sm:$0x1] }
  0x83   : > { %v380_v45 = vsel %vm1303_vm1, %v1307_v21, -inf  ;;  %v381_v46 = vsel %vm1303_vm1, %v1309_v22, -inf  ;;  %v382_v47 = vsel %vm1303_vm1, %v1319_v31, -inf  ;;  %v383_v48 = vsel %vm1303_vm1, %v1321_v32, -inf  ;;  %s1460_s22 = smov 0.0   ;;  %s1462_s5 = smov 0  }
  0x84   : > { %v351_v49 = vsel %vm1311_vm3, %v343_v29, %v727_v39  ;;  %v352_v50 = vsel %vm1315_vm4, %v344_v30, %v728_v40  ;;  %v353_v51 = vsel %vm1323_vm5, %v345_v35, %v729_v41  ;;  %v354_v52 = vsel %vm1327_vm6, %v346_v36, %v730_v42 }
  0x85   : > { %v355_v53 = vmul.f32 %v1300_v13, %v351_v49  ;;  %v356_v54 = vmul.f32 %v1300_v13, %v352_v50  ;;  %v357_v55 = vmul.f32 %v1300_v13, %v353_v51  ;;  %v358_v56 = vmul.f32 %v1300_v13, %v354_v52 }
  0x86   : > { %v384_v57 = vsel %vm1303_vm1, %v1331_v37, -inf  ;;  %v386_v58 = vsel %vm1303_vm1, %v1333_v38, -inf  ;;  %v388_v59 = vsel %vm1303_vm1, %v1335_v43, -inf  ;;  %v390_v60 = vsel %vm1303_vm1, %v1337_v44, -inf }
  0x87   : > { %v360_v61 = vsel %vm359_vm2, %v355_v53, 0.0  ;;  %v361_v62 = vsel %vm359_vm2, %v356_v54, 0.0  ;;  %v363_v63 = vsel %vm359_vm2, %v357_v55, 0.0  ;;  %v385_v2 = vmax.f32 %v380_v45, %v384_v57 }
  0x88   : > { %v362_v1 = vadd.f32 %v361_v62, %v360_v61  ;;  %v387_v4 = vmax.f32 %v381_v46, %v386_v58  ;;  %v389_v5 = vmax.f32 %v382_v47, %v388_v59  ;;  %v365_v6 = vsel %vm359_vm2, %v358_v56, 0.0 }
  0x89   : > { %v391_v7 = vmax.f32 %v383_v48, %v390_v60  ;;  %v485_v15 = vsel %vm359_vm2, %v1300_v13, 0.0  ;;  %vm437_vm7 = vcmp.eq.s32.totalorder %v1294_v0, 0  ;;  %vm438_vm8 = vcmp.eq.s32.totalorder %v1294_v0, 1 }
  0x8a   : > { %v364_v8 = vadd.f32 %v363_v63, %v362_v1  ;;  %v392_v9 = vmax.f32 %v385_v2, %v387_v4  ;;  %v731_v35 = vsel %vm437_vm7, 1.0, %v1052_v12  ;;  %v732_v36 = vsel %vm438_vm8, 1.0, %v1052_v12 }
  0x8b   : > { %v393_v10 = vmax.f32 %v389_v5, %v391_v7  ;;  %vm439_vm9 = vcmp.eq.s32.totalorder %v1294_v0, 2  ;;  %v461_v40 = vmul.f32 %v731_v35, %v1307_v21  ;;  %v462_v41 = vmul.f32 %v732_v36, %v1309_v22 }
  0x8c   : > { %v366_v11 = vadd.f32 %v365_v6, %v364_v8  ;;  %v733_v42 = vsel %vm439_vm9, 1.0, %v1052_v12  ;;  %vm440_vm10 = vcmp.eq.s32.totalorder %v1294_v0, 3  ;;  %vm441_vm11 = vcmp.eq.s32.totalorder %v1294_v0, 4 }
  0x8d   : > { %v1379_v14 = vmax.f32 %v392_v9, %v393_v10  ;;  %v463_v48 = vmul.f32 %v733_v42, %v1319_v31  ;;  %v469_v49 = vsel %vm359_vm2, %v461_v40, 0.0  ;;  %v470_v50 = vsel %vm359_vm2, %v462_v41, 0.0 }
  0x8e   : > { %367 = vadd.xlane.f32.xlu0 %v366_v11  ;;  %v471_v57 = vadd.f32 %v470_v50, %v469_v49  ;;  %v735_v62 = vsel %vm441_vm11, 1.0, %v1052_v12  ;;  %vm442_vm12 = vcmp.eq.s32.totalorder %v1294_v0, 5  ;;  %vm443_vm13 = vcmp.eq.s32.totalorder %v1294_v0, 6 }
  0x8f   : > { %v395_v16 = vsub.f32 %v1307_v21, %v1379_v14  ;;  %v396_v17 = vsub.f32 %v1309_v22, %v1379_v14  ;;  %v397_v18 = vsub.f32 %v1319_v31, %v1379_v14  ;;  %v398_v19 = vsub.f32 %v1321_v32, %v1379_v14 }
  0x90   : > { %v399_v20 = vsub.f32 %v1331_v37, %v1379_v14  ;;  %v400_v23 = vsub.f32 %v1333_v38, %v1379_v14  ;;  %v401_v27 = vsub.f32 %v1335_v43, %v1379_v14  ;;  %v402_v30 = vsub.f32 %v1337_v44, %v1379_v14 }
  0x91   : > { %v403_v24 = vmul.f32 1.442695, %v395_v16  ;;  %v405_v25 = vmul.f32 1.442695, %v396_v17  ;;  %v407_v26 = vmul.f32 1.442695, %v397_v18  ;;  %v465_v7 = vmul.f32 %v735_v62, %v1331_v37 }
  0x92   : > { %486 = vadd.xlane.f32.xlu0 %v485_v15  ;;  %v409_v28 = vmul.f32 1.442695, %v398_v19  ;;  %v411_v29 = vmul.f32 1.442695, %v399_v20  ;;  %v413_v33 = vmul.f32 1.442695, %v400_v23 }
  0x93   : > { %843 = vpow2.f32 %v403_v24  ;;  %v415_v34 = vmul.f32 1.442695, %v401_v27  ;;  %v417_v39 = vmul.f32 1.442695, %v402_v30  ;;  %v734_v22 = vsel %vm440_vm10, 1.0, %v1052_v12 }
  0x94   : > { %845 = vpow2.f32 %v405_v25  ;;  %v464_v59 = vmul.f32 %v734_v22, %v1321_v32  ;;  %v472_v60 = vsel %vm359_vm2, %v463_v48, 0.0  ;;  %v736_v9 = vsel %vm442_vm12, 1.0, %v1052_v12 }
  0x95   : > { %847 = vpow2.f32 %v407_v26  ;;  %v473_v4 = vadd.f32 %v472_v60, %v471_v57  ;;  %v466_v17 = vmul.f32 %v736_v9, %v1333_v38  ;;  %v476_v18 = vsel %vm359_vm2, %v465_v7, 0.0 }
  0x96   : > { %849 = vpow2.f32 %v409_v28  ;;  %v474_v8 = vsel %vm359_vm2, %v464_v59, 0.0  ;;  %v737_v19 = vsel %vm443_vm13, 1.0, %v1052_v12  ;;  %vm444_vm14 = vcmp.eq.s32.totalorder %v1294_v0, 7 }
  0x97   : > { %851 = vpow2.f32 %v411_v29  ;;  %v475_v15 = vadd.f32 %v474_v8, %v473_v4  ;;  %v467_v23 = vmul.f32 %v737_v19, %v1335_v43  ;;  %v478_v24 = vsel %vm359_vm2, %v466_v17, 0.0 }
  0x98   : > { %853 = vpow2.f32 %v413_v33  ;;  %v738_v25 = vsel %vm444_vm14, 1.0, %v1052_v12  ;;  %vm315_vm15 = vcmp.ge.s32.totalorder %v1294_v0, 0  ;;  %vm1053_vm1 = vmmov 1  }
  0x99   : > { %855 = vpow2.f32 %v415_v34  ;;  %v477_v20 = vadd.f32 %v476_v18, %v475_v15  ;;  %v468_v27 = vmul.f32 %v738_v25, %v1337_v44  ;;  %v480_v38 = vsel %vm359_vm2, %v467_v23, 0.0  ;;  %vm497_vm3 = vmxor %vm316_vm0, %vm1053_vm1 }
  0x9a   : > { %857 = vpow2.f32 %v417_v39  ;;  %vm498_vm4 = vmand %vm315_vm15, %vm497_vm3 }
  0x9b   : > { %v479_v26 = vadd.f32 %v478_v24, %v477_v20  ;;  %v482_v29 = vsel %vm359_vm2, %v468_v27, 0.0 }
  0x9d   : > { %v844_v45 = vpop.eup %843  ;;  %v481_v28 = vadd.f32 %v480_v38, %v479_v26 }
  0x9e   : > { %v846_v46 = vpop.eup %845  ;;  %v419_v47 = vsel %vm359_vm2, %v844_v45, 0.0 }
  0x9f   : > { %v848_v51 = vpop.eup %847  ;;  %v420_v21 = vsel %vm359_vm2, %v846_v46, 0.0  ;;  %v483_v34 = vadd.f32 %v482_v29, %v481_v28 }
  0xa0   : > { %v850_v52 = vpop.eup %849  ;;  %v421_v53 = vadd.f32 %v420_v21, %v419_v47  ;;  %v422_v54 = vsel %vm359_vm2, %v848_v51, 0.0 }
  0xa1   : > { %v852_v55 = vpop.eup %851  ;;  %v424_v56 = vsel %vm359_vm2, %v850_v52, 0.0 }
  0xa2   : > { %v854_v31 = vpop.eup %853  ;;  %v423_v58 = vadd.f32 %v422_v54, %v421_v53  ;;  %v426_v61 = vsel %vm359_vm2, %v852_v55, 0.0 }
  0xa3   : > { %v856_v63 = vpop.eup %855  ;;  %v428_v2 = vsel %vm359_vm2, %v854_v31, 0.0 }
  0xa4   : > { %v425_v1 = vadd.f32 %v424_v56, %v423_v58  ;;  %v858_v5 = vpop.eup %857  ;;  %v430_v32 = vsel %vm359_vm2, %v856_v63, 0.0 }
  0xa5   : > { %v432_v11 = vsel %vm359_vm2, %v858_v5, 0.0 }
  0xa6   : > { %v427_v6 = vadd.f32 %v426_v61, %v425_v1 }
  0xa8   : > { %v429_v10 = vadd.f32 %v428_v2, %v427_v6 }
  0xaa   : > { %v431_v16 = vadd.f32 %v430_v32, %v429_v10 }
  0xac   : > { %v433_v37 = vadd.f32 %v432_v11, %v431_v16 }
  0xae   : > { %859 = vlog2.f32 %v433_v37 }
  0xb8   : > { %v860_v30 = vpop.eup %859 }
  0xb9   : > { %v435_v33 = vmul.f32 0.6931472, %v860_v30 }
  0xbb   : > { %v436_v43 = vadd.f32 %v435_v33, %v1379_v14 }
  0xbd   : > { %v1443_v35 = vsub.f32 %v436_v43, %v483_v34 }
  0xbf   : > { %v1446_v44 = vsel %vm498_vm4, %v1443_v35, -1.0 }
  0xc0   : > { %v500_v36 = vsel %vm359_vm2, %v1446_v44, -inf }
  0xc1   : > { %501 = vmax.xlane.f32.xlu1 %v500_v36 }
 0x11b   : > { %v368_v39 = vpop.xlane.xlu0 %367 }
 0x11c   : > { %v369_v40 = vrot.slane %v368_v39, 4 }
 0x11e   : > { %v370_v41 = vadd.f32 %v369_v40, %v368_v39 }
 0x11f   : > { %v487_v42 = vpop.xlane.xlu0 %486 }
 0x120   : > { %v371_v45 = vrot.slane %v370_v41, 2  ;;  %v488_v46 = vrot.slane %v487_v42, 4 }
 0x122   : > { %v489_v0 = vadd.f32 %v488_v46, %v487_v42  ;;  %v372_v47 = vadd.f32 %v371_v45, %v370_v41 }
 0x124   : > { %v490_v48 = vrot.slane %v489_v0, 2  ;;  %v373_v14 = vrot.slane %v372_v47, 1 }
 0x126   : > { %v491_v49 = vadd.f32 %v490_v48, %v489_v0  ;;  %v374_v50 = vadd.f32 %v373_v14, %v372_v47 }
 0x128   : > { %747 = vpush %v374_v50  ;;  %v492_v51 = vrot.slane %v491_v49, 1 }
 0x12a   : > { %v493_v21 = vadd.f32 %v492_v51, %v491_v49 }
 0x12c   : > { %749 = vpush %v493_v21 }
 0x14e   : > { %v502_v22 = vpop.xlane.xlu1 %501 }
 0x14f   : > { %v503_v52 = vrot.slane %v502_v22, 4 }
 0x151   : > { %v504_v53 = vmax.f32 %v502_v22, %v503_v52 }
 0x153   : > { %v505_v54 = vrot.slane %v504_v53, 2 }
 0x155   : > { %v506_v55 = vmax.f32 %v504_v53, %v505_v54 }
 0x157   : > { %v507_v56 = vrot.slane %v506_v55, 1 }
 0x159   : > { %v508_v57 = vmax.f32 %v506_v55, %v507_v56  ;;  %s1450_s7 = spop %747 }
 0x15b   : > { %751 = vpush %v508_v57 }
 0x15d   : > { %s1452_s8 = spop %749 }
 0x15e   : > { %s495_s28 = smul.f32 3.0, %s1452_s8 }
 0x160   : > { %s1455_s20 = smin.f32 %s1054_s9, %s495_s28 }
 0x18c   : > { %s752_s29 = spop %751 }
 0x18d   : > { %s510_s14 = sadd.f32 1.0, %s752_s29  }
 0x18e LB: >> { %s519_s12 = sadd.f32 %s1037_s14, %s1041_s22  ;;  %v1055_v58 = vmov 0.0   ;;  %s516_s5 = sadd.s32 1, %s1045_s5   ;;  %s1045_s5 = sphi %s1462_s5, %s516_s5   ;;  %s1041_s22 = sphi %s1460_s22, %s1572_s22   ;;  %s1037_s14 = sphi %s510_s14, %s1581_s14  }
 0x18f   : >> { %p513_p6 = scmp.ge.s32.totalorder %s516_s5, 40  }
 0x190   : >> { %s520_s10 = smul.f32 0.5, %s519_s12  ;;  %v564_v37 = vstv (%p513_p6), %s1452_s8  ;;  %s741_s1 = sshll.u32 (%p513_p6), %s1103_s19, 4 }
 0x191   : > { %s581_s11 = sshll.u32 (%p513_p6), %s302_s6, 4  ;;  %s1490_s9 = scalar_lea.hbm (%p513_p6), %s1540_s4, %s741_s1  ;;  %s1492_s11 = int_to_ptr.vmem [resolvable:$true] %s581_s11 }
 0x192   : >> { %v521_v31 = vstv %s520_s10  ;;  %s951_s8 = scalar_lea.vmem (%p513_p6), %s1492_s11, 16  ;;  %p1573_p12 = scmp.ne.s32.totalorder (%p513_p6), %s1550_s26, 0 }
 0x193   : >> { %vm522_vm0 = vcmp.ge.f32.partialorder %v1446_v44, %v521_v31  ;;  %p952_p9 = scmp.ne.s32.totalorder (%p513_p6), %s1492_s11, %s951_s8  ;;  %s1056_s19 = smov (%p513_p6), [#allocation8]  }
 0x194   : >> { %v739_v59 = vsel %vm522_vm0, 1.0, %v1055_v58 }
 0x195   : >> { %v525_v60 = vsel %vm359_vm2, %v739_v59, 0.0  ;;  %p953_p0 = pnand (%p513_p6), %p952_p9, %p1573_p12 }
 0x196   : >> { %526 = vadd.xlane.f32.xlu0 %v525_v60 }
 0x197   : > { %p954_p8 = pneg (%p513_p6), %p953_p0 }
 0x223   : >> { %v527_v61 = vpop.xlane.xlu0 %526 }
 0x224   : >> { %v528_v62 = vrot.slane %v527_v61, 4 }
 0x226   : >> { %v529_v63 = vadd.f32 %v528_v62, %v527_v61 }
 0x228   : >> { %v530_v1 = vrot.slane %v529_v63, 2 }
 0x22a   : >> { %v531_v2 = vadd.f32 %v530_v1, %v529_v63 }
 0x22c   : >> { %v532_v4 = vrot.slane %v531_v2, 1 }
 0x22e   : >> { %v533_v5 = vadd.f32 %v532_v4, %v531_v2 }
 0x230   : >> { %753 = vpush %v533_v5 }
 0x260   : > { %515 = sbr.rel (!%p513_p6) target bundleno = 398 (0x18e), region = 115 }
 0x261   : >> { %s754_s13 = spop %753 }
 0x262   : >> { %p535_p7 = scmp.ge.f32.partialorder %s754_s13, %s1455_s20  ;;  %s955_s20 = sshll.u32 (%p513_p6), %s1056_s19, 4  ;;  %s956_s20 = int_to_ptr.vmem [resolvable:$false] %s955_s20 }
 0x263   : > { %s957_s29 = scalar_lea.vmem (%p513_p6), %s956_s20, 32  ;;  %p958_p10 = scmp.lt.s32.totalorder (%p513_p6), %s1492_s11, %s956_s20 }
 0x264   : >> { %s536_s23 = scalar_select %p535_p7, %s520_s10, %s1041_s22  }
 0x265   : >> { %s1581_s14 = smov (!%p535_p7, %s1037_s14), %s520_s10  ;;  %p959_p11 = scmp.lt.s32.totalorder (%p513_p6), %s957_s29, %s951_s8 }
 0x266   : >> { %s1572_s22 = smov %s536_s23  ;;  %v538_v6 = vstv (%p513_p6), %s536_s23 }
 0x267   : > { %vm539_vm5 = vcmp.ge.f32.partialorder %v1446_v44, %v538_v6  ;;  %p960_p4 = por %p959_p11, %p958_p10 }
 0x268   : > { %v740_v7 = vsel %vm539_vm5, 1.0, %v1052_v12  ;;  %v555_v12 = vand.u32 127, %v376_v3 }
 0x269   : > { %v542_v8 = vadd.f32 %v740_v7, %v1300_v13  ;;  %v557_v13 = vstv %s1450_s7  ;;  %s569_s7 = scalar_lea.sflag [#allocation4], %s1275_s0  ;;  %p961_p3 = pnand %p960_p4, %p954_p8 }
 0x26a   : > { %vm556_vm6 = vcmp.eq.s32.totalorder %v555_v12, 0  ;;  %vm559_vm7 = vcmp.eq.s32.totalorder %v555_v12, 1  ;;  %vm563_vm8 = vcmp.eq.s32.totalorder %v555_v12, 2 }
 0x26b   : > { %v543_v32 = vmul.f32 %v542_v8, %v1443_v35  ;;  %v558_v20 = vsel %vm556_vm6, %v557_v13, 0.0  ;;  %v565_v25 = vsel %vm563_vm8, %v564_v37, 0.0 }
 0x26d   : > { %v544_v9 = vsel %vm359_vm2, %v543_v32, 0.0 }
 0x26e   : > { %545 = vadd.xlane.f32.xlu0 %v544_v9 }
 0x2fb   : > { %v546_v10 = vpop.xlane.xlu0 %545 }
 0x2fc   : > { %v547_v11 = vrot.slane %v546_v10, 4 }
 0x2fe   : > { %v548_v15 = vadd.f32 %v547_v11, %v546_v10 }
 0x300   : > { %v549_v16 = vrot.slane %v548_v15, 2 }
 0x302   : > { %v550_v17 = vadd.f32 %v549_v16, %v548_v15 }
 0x304   : > { %v551_v18 = vrot.slane %v550_v17, 1 }
 0x306   : > { %v552_v19 = vadd.f32 %v551_v18, %v550_v17 }
 0x308   : > { %755 = vpush %v552_v19 }
 0x339   : > { %s756_s30 = spop %755 }
 0x33a   : > { %v560_v23 = vstv %s756_s30 }
 0x33b   : > { %v561_v24 = vsel %vm559_vm7, %v560_v23, 0.0 }
 0x33c   : > { %v562_v26 = vadd.f32 %v561_v24, %v558_v20 }
 0x33e   : > { %v566_v27 = vadd.f32 %v565_v25, %v562_v26 }
 0x340   : > { %567 = vst [vmem:[%s302_s6] sm:$0x1] %v566_v27 }
 0x341   : > { %964 = shalt.err (!%p961_p3)
}
 0x342   : > { %s965_s0 = scalar_lea.hbm %s1490_s9, 16  ;;  %s969_s22 = scalar_lea.hbm %s1540_s4, 32 }
 0x343   : > { %p966_p5 = scmp.ne.s32.totalorder %s1490_s9, %s965_s0  ;;  %p970_p13 = scmp.lt.u32.totalorder %s1490_s9, %s1540_s4 }
 0x344   : > { %p971_p7 = scmp.lt.u32.totalorder %s969_s22, %s965_s0  ;;  %p973_p9 = scmp.lt.u32.totalorder %s965_s0, %s1490_s9 }
 0x345   : > { %p967_p2 = pnand %p966_p5, %p1573_p12 }
 0x346   : > { %p972_p6 = por %p971_p7, %p970_p13 }
 0x347   : > { %p968_p1 = pneg %p967_p2 }
 0x348   : > { %p974_p0 = por %p973_p9, %p972_p6 }
 0x34a   : > { %p975_p8 = pnand %p974_p0, %p968_p1 }
 0x34c   : > { %978 = shalt.err (!%p975_p8)
}
 0x34d   : > { %763 = dma.vmem_to_hbm [thread:$0]  (%p1573_p12), %s1492_s11, 16, %s1490_s9, %s569_s7  }
 0x34e PF: > { %s593_s10 = sand.u32 1, %s1021_s15   ;;  %p1574_p10 = scmp.ne.s32.totalorder %s1551_s27, 0 }
 0x34f   : > { %p1575_p11 = scmp.ge.s32.totalorder %s1033_s18, 2  ;;  %s594_s13 = scalar_lea.sflag [#allocation4], %s593_s10 }
 0x351   : > { %p776_p4 = pnand %p1575_p11, %p1574_p10 }
 0x353   : > { %1016 = dma.done.wait (!%p776_p4), %s594_s13, 16  }
 0x354   : > { %1018 = vsyncadd (!%p776_p4), %s594_s13, 4294967280  ;;  %p20_p3 = scmp.ge.s32.totalorder %s1107_s21, 4   ;;  %s1576_s15 = smov %s1025_s16 }
 0x355   : > { %s1577_s16 = smov %s1029_s17  ;;  %s1578_s17 = smov %s1119_s24 }
 0x356   : > { %s1579_s18 = smov %s1107_s21  ;;  %22 = sbr.rel (!%p20_p3) target bundleno = 10 (0xa), region = 126 }
 0x35d   :  { %598 = vsyncpa [#allocation3], 1 }
 0x35e   :  { %600 = vsyncpa [#allocation3 + $0x1], 1 }
 0x35f   :  { %601 = vsyncpa [#allocation6], 1 }
 0x360   :  { %603 = vsyncpa [#allocation6 + $0x1], 1 }
 0x361   :  { %604 = vsyncpa [#allocation4], 1 }
 0x362   :  { %606 = vsyncpa [#allocation4 + $0x1], 1 }

</bundles_post_ra>
